<compile_context>
chip_gen: v7x
topology: tpu7x:2x2x1
jax: 0.10.0
libtpu: 0.0.40
codegen_flags: <defaults>
</compile_context>

<pallas_src>
import functools

import jax
import jax.numpy as jnp
from jax.experimental import pallas as pl
from jax.experimental.pallas import tpu as pltpu

_LANES = (512, 256, 128)     # lane-dense candidates (multiples of 128)
_MAX_BLOCK_ROWS = 1024       # up to 2 MiB f32 tiles at 512 lanes

_K1 = 0x9E3779B1             # golden-ratio multiplicative-hash constant
_K2 = 0x85EBCA6B
_K3 = 0x7FEB352D


def _mix(h):
    """One multiply-xorshift finisher round (uint32 -> uint32)."""
    h = h ^ (h >> 16)
    h = h * jnp.uint32(_K3)
    h = h ^ (h >> 15)
    return h


def _keep_mask_from_flat_idx(idx_u32, seed_u32, threshold):
    """Plain-JAX reference mask: keep iff hash(seed, idx) top-31 bits >= threshold.

    Identical to the in-kernel formula: h = idx*K1 + seed*K2 (mod 2^32), then
    one multiply-xorshift round.  Keep probability is 1 - round(p*2^31)/2^31
    (off from 1-p by at most 2^-31).
    """
    h = idx_u32 * jnp.uint32(_K1) + seed_u32 * jnp.uint32(_K2)
    h = _mix(h)
    return (h >> 1).astype(jnp.int32) >= jnp.int32(threshold)


def _dropout_kernel(seed_ref, ramp_ref, x_ref, o_ref, *,
                    block_rows, lane, threshold, scale):
    # Scalar (per-tile) part of the hash: (tile_start*K1 + seed*K2) mod 2^32.
    # NOTE: flat indices are 32-bit; arrays with > 2^31 elements would wrap.
    tile_start = pl.program_id(0) * (block_rows * lane)
    base = (tile_start.astype(jnp.uint32) * jnp.uint32(_K1)
            + seed_ref[0].astype(jnp.uint32) * jnp.uint32(_K2))

    # ramp_ref holds local_flat_idx * K1 precomputed (VMEM-resident, fetched
    # once): idx*K1 + base == flat_idx*K1 + seed*K2 for a single vadd.
    h = _mix(ramp_ref[...] + base)
    keep = (h >> 1).astype(jnp.int32) >= jnp.int32(threshold)

    # Fused mask + scale in the input's native dtype (no f32 round trip).
    xv = x_ref[...]
    scaled = xv * jnp.asarray(scale, dtype=xv.dtype)
    o_ref[...] = jnp.where(keep, scaled, jnp.zeros_like(xv)).astype(o_ref.dtype)


def repeatable_dropout(x, seed, p=0.1, training=True):
    """x: any-shape array (e.g. NCHW). seed: python int. Same shape/dtype out."""
    if not training or p <= 0.0:
        return x
    if p >= 1.0:
        return jnp.zeros_like(x)

    orig_shape = x.shape
    total = int(x.size)
    threshold = min(int(round(p * float(1 << 31))), (1 << 31) - 1)
    scale = 1.0 / (1.0 - p)
    seed_u32 = jnp.asarray(seed, dtype=jnp.int32).astype(jnp.uint32)

    # Pick a lane width (multiple of 128 -> unmasked vst) that divides the
    # element count so the common case is a zero-copy reshape.  Otherwise run
    # the kernel on the lane-divisible bulk and handle the < lane tail in
    # plain JAX (no whole-array pad/slice passes).
    lane = next((l for l in _LANES if total % l == 0), _LANES[0])
    bulk = (total // lane) * lane
    tail = total - bulk

    flat = x.reshape(-1)
    out_parts = []

    if bulk > 0:
        rows = bulk // lane
        block_rows = rows if rows <= _MAX_BLOCK_ROWS else _MAX_BLOCK_ROWS
        grid = (pl.cdiv(rows, block_rows),)  # ragged last block is clipped

        x2d = (flat if tail == 0 else flat[:bulk]).reshape(rows, lane)

        # Per-tile local index ramp, pre-multiplied by K1 (uint32 wraparound).
        ramp = (jnp.arange(block_rows * lane, dtype=jnp.uint32)
                * jnp.uint32(_K1)).reshape(block_rows, lane)

        seed_arr = jnp.asarray([seed], dtype=jnp.int32)

        kernel = functools.partial(
            _dropout_kernel, block_rows=block_rows, lane=lane,
            threshold=threshold, scale=scale)

        out2d = pl.pallas_call(
            kernel,
            out_shape=jax.ShapeDtypeStruct((rows, lane), x.dtype),
            grid_spec=pltpu.PrefetchScalarGridSpec(
                num_scalar_prefetch=1,
                grid=grid,
                in_specs=[
                    # ramp: constant index_map -> DMA'd once, stays resident.
                    pl.BlockSpec((block_rows, lane), lambda i, seed: (0, 0)),
                    pl.BlockSpec((block_rows, lane), lambda i, seed: (i, 0)),
                ],
                out_specs=pl.BlockSpec((block_rows, lane),
                                       lambda i, seed: (i, 0)),
            ),
            compiler_params=pltpu.CompilerParams(
                dimension_semantics=("parallel",),
                vmem_limit_bytes=32 * 1024 * 1024),
            cost_estimate=pl.CostEstimate(
                flops=4 * bulk,
                transcendentals=0,
                bytes_accessed=2 * bulk * x.dtype.itemsize),
        )(seed_arr, ramp, x2d)
        out_parts.append(out2d.reshape(-1))

    if tail > 0:
        idx = jnp.arange(tail, dtype=jnp.uint32) + jnp.uint32(bulk)
        keep = _keep_mask_from_flat_idx(idx, seed_u32, threshold)
        xt = flat[bulk:]
        out_parts.append(
            jnp.where(keep, xt * jnp.asarray(scale, dtype=x.dtype),
                      jnp.zeros_like(xt)))

    if len(out_parts) == 1:
        return out_parts[0].reshape(orig_shape)
    return jnp.concatenate(out_parts).reshape(orig_shape)


# TODO(synk): the PyTorch module caches the mask in mutable Python state
# (self.mask); here repeatability comes from a deterministic seed-derived
# mask instead of mutable module state.


def _check_dropout_semantics(x, y, p, lo=0.02, hi=0.35):
    scaled = x / (1.0 - p)
    is_zero = jnp.isclose(y, 0.0, atol=1e-6)
    is_scaled = jnp.isclose(y, scaled, rtol=1e-5, atol=1e-6)
    assert bool(jnp.all(is_zero | is_scaled)), "output not {0, x/(1-p)}"
    drop_frac = float(jnp.mean(is_zero.astype(jnp.float32)))
    assert lo <= drop_frac <= hi, f"unexpected drop fraction {drop_frac}"


if __name__ == "__main__":
    key = jax.random.PRNGKey(0)
    p = 0.1
    seed = 1234

    # --- Test 1: module-sized NCHW input, zero-copy lane path (2048 elems) ---
    x = jax.random.normal(key, (2, 4, 16, 16), dtype=jnp.float32)
    y1 = jax.block_until_ready(repeatable_dropout(x, seed, p=p, training=True))
    y2 = jax.block_until_ready(repeatable_dropout(x, seed, p=p, training=True))
    assert jnp.array_equal(y1, y2), "mask not repeatable"
    _check_dropout_semantics(x, y1, p, lo=0.0, hi=0.35)

    # eval mode: identity
    y_eval = jax.block_until_ready(
        repeatable_dropout(x, seed, p=p, training=False))
    assert jnp.array_equal(y_eval, x)

    # --- Test 2: multi-tile grid with ragged last block (2500 rows x 512) ---
    k2 = jax.random.PRNGKey(1)
    x2 = jax.random.normal(k2, (2, 10, 125, 512), dtype=jnp.float32)
    z1 = jax.block_until_ready(repeatable_dropout(x2, seed, p=p, training=True))
    z2 = jax.block_until_ready(repeatable_dropout(x2, seed, p=p, training=True))
    assert jnp.array_equal(z1, z2), "mask not repeatable (ragged grid)"
    _check_dropout_semantics(x2, z1, p, lo=0.03, hi=0.25)

    # --- Test 3: non-lane-divisible size -> bulk kernel + plain-JAX tail ---
    k3 = jax.random.PRNGKey(2)
    x3 = jax.random.normal(k3, (3, 5, 37, 29), dtype=jnp.float32)  # 16095 elems
    w1 = jax.block_until_ready(repeatable_dropout(x3, seed, p=p, training=True))
    w2 = jax.block_until_ready(repeatable_dropout(x3, seed, p=p, training=True))
    assert jnp.array_equal(w1, w2), "mask not repeatable (tail path)"
    _check_dropout_semantics(x3, w1, p, lo=0.03, hi=0.25)

    print("KERNEL_OK")
</pallas_src>

<mosaic_0001>
module attributes {stable_mosaic.version = 11 : i64} {
  func.func @_dropout_kernel(%arg0: i32, %arg1: memref<1xi32, #tpu.memory_space<smem>>, %arg2: memref<4x512xi32, #tpu.memory_space<vmem>>, %arg3: memref<4x512xf32, #tpu.memory_space<vmem>>, %arg4: memref<4x512xf32, #tpu.memory_space<vmem>>) attributes {dimension_semantics = [#tpu.dimension_semantics<parallel>], iteration_bounds = array<i64: 1>, scalar_prefetch = 1 : i64, scratch_operands = 0 : i64, tpu.core_type = #tpu.core_type<tc>, window_params = [{pipeline_mode = #tpu.pipeline_mode<synchronous>, transform_indices = @transform_0, window_bounds = array<i64: 4, 512>}, {transform_indices = @transform_1, window_bounds = array<i64: 4, 512>}, {transform_indices = @transform_2, window_bounds = array<i64: 4, 512>}]} {
    %c2048_i32 = arith.constant 2048 : i32
    %0 = arith.muli %arg0, %c2048_i32 : i32
    %c-1640531535_i32 = arith.constant -1640531535 : i32
    %1 = arith.muli %0, %c-1640531535_i32 : i32
    %c0 = arith.constant 0 : index
    %2 = memref.load %arg1[%c0] : memref<1xi32, #tpu.memory_space<smem>>
    %c-2048144789_i32 = arith.constant -2048144789 : i32
    %3 = arith.muli %2, %c-2048144789_i32 : i32
    %4 = arith.addi %1, %3 : i32
    %c0_0 = arith.constant 0 : index
    %c0_1 = arith.constant 0 : index
    %5 = vector.load %arg2[%c0_0, %c0_1] : memref<4x512xi32, #tpu.memory_space<vmem>>, vector<4x512xi32>
    %6 = vector.broadcast %4 : i32 to vector<4x512xi32>
    %7 = arith.addi %5, %6 : vector<4x512xi32>
    %c16_i32 = arith.constant 16 : i32
    %8 = vector.broadcast %c16_i32 : i32 to vector<4x512xi32>
    %9 = arith.shrui %7, %8 : vector<4x512xi32>
    %10 = arith.xori %7, %9 : vector<4x512xi32>
    %c2146121005_i32 = arith.constant 2146121005 : i32
    %11 = vector.broadcast %c2146121005_i32 : i32 to vector<4x512xi32>
    %12 = arith.muli %10, %11 : vector<4x512xi32>
    %c15_i32 = arith.constant 15 : i32
    %13 = vector.broadcast %c15_i32 : i32 to vector<4x512xi32>
    %14 = arith.shrui %12, %13 : vector<4x512xi32>
    %15 = arith.xori %12, %14 : vector<4x512xi32>
    %c1_i32 = arith.constant 1 : i32
    %16 = vector.broadcast %c1_i32 : i32 to vector<4x512xi32>
    %17 = arith.shrui %15, %16 : vector<4x512xi32>
    %c214748365_i32 = arith.constant 214748365 : i32
    %18 = vector.broadcast %c214748365_i32 : i32 to vector<4x512xi32>
    %19 = arith.cmpi sge, %17, %18 : vector<4x512xi32>
    %c0_2 = arith.constant 0 : index
    %c0_3 = arith.constant 0 : index
    %20 = vector.load %arg3[%c0_2, %c0_3] : memref<4x512xf32, #tpu.memory_space<vmem>>, vector<4x512xf32>
    %cst = arith.constant 1.11111116 : f32
    %21 = vector.broadcast %cst : f32 to vector<4x512xf32>
    %22 = arith.mulf %20, %21 : vector<4x512xf32>
    %cst_4 = arith.constant 0.000000e+00 : f32
    %23 = vector.broadcast %cst_4 : f32 to vector<4x512xf32>
    %24 = arith.select %19, %22, %23 : vector<4x512xi1>, vector<4x512xf32>
    %c0_5 = arith.constant 0 : index
    %c0_6 = arith.constant 0 : index
    %25 = vector.load %arg4[%c0_5, %c0_6] : memref<4x512xf32, #tpu.memory_space<vmem>>, vector<4x512xf32>
    tpu.vector_store %arg4[%c0_5, %c0_6], %24 {strides = array<i32>} : memref<4x512xf32, #tpu.memory_space<vmem>>, vector<4x512xf32>,
    return
  }
  func.func @transform_0(%arg0: i32, %arg1: memref<1xi32, #tpu.memory_space<smem>>) -> (i32, i32) {
    %c0_i32 = arith.constant 0 : i32
    %c0_i32_0 = arith.constant 0 : i32
    %c0_i32_1 = arith.constant 0 : i32
    return %c0_i32, %c0_i32_0 : i32, i32
  }
  func.func @transform_1(%arg0: i32, %arg1: memref<1xi32, #tpu.memory_space<smem>>) -> (i32, i32) {
    %c0_i32 = arith.constant 0 : i32
    %c0_i32_0 = arith.constant 0 : i32
    return %arg0, %c0_i32 : i32, i32
  }
  func.func @transform_2(%arg0: i32, %arg1: memref<1xi32, #tpu.memory_space<smem>>) -> (i32, i32) {
    %c0_i32 = arith.constant 0 : i32
    %c0_i32_0 = arith.constant 0 : i32
    return %arg0, %c0_i32 : i32, i32
  }
}

</mosaic_0001>

<bundles_post_ra>
// kernel: tpu_custom_call.1
= control target key start
LH: loop header
LB: loop body
LE: loop exit
PB: predicated region body
PF: predicated region fallthrough
CT: control target
= control target key end

     0   :  { %9 = vsyncpa [#allocation5], 0  ;;  %s222_s0 = inlined_call_operand.<no memory space> [shape: s32[1], index: 0, kind: input, shape index: {}]   ;;  %s223_s1 = inlined_call_operand.hbm [shape: u32[4,512], index: 1, kind: input, shape index: {}]   ;;  %s224_s2 = inlined_call_operand.hbm [shape: f32[4,512], index: 2, kind: input, shape index: {}]   ;;  %s225_s3 = inlined_call_operand.hbm [shape: f32[4,512], index: 3, kind: output, shape index: {}]  }
   0x1   :  { %10 = vsyncpa [#allocation8], 0 }
   0x2   :  { %11 = vsyncpa [#allocation6], 0  ;;  %s160_s12 = smov [#allocation4]   ;;  %s161_s14 = smov [#allocation7]  }
   0x3   :  { %s18_s13 = sshll.u32 %s160_s12, 4  ;;  %s28_s15 = sshll.u32 %s161_s14, 4  ;;  %s19_s13 = int_to_ptr.vmem [resolvable:$true] %s18_s13  ;;  %s29_s15 = int_to_ptr.vmem [resolvable:$true] %s28_s15 }
   0x4   :  { %s88_s18 = scalar_lea.hbm %s223_s1, 256 }
   0x5   :  { %p89_p0 = scmp.ne.s32.totalorder %s223_s1, %s88_s18  ;;  %p92_p1 = scmp.lt.u32.totalorder %s88_s18, %s223_s1 }
   0x7   :  { %p94_p2 = pnand %p92_p1, %p89_p0 }
   0x9   :  { %97 = shalt.err (!%p94_p2)
}
   0xa   :  { %s98_s23 = scalar_lea.vmem %s19_s13, 256  ;;  %p103_p4 = scmp.lt.s32.totalorder %s19_s13, %s19_s13 }
   0xb   :  { %p99_p3 = scmp.ne.s32.totalorder %s19_s13, %s98_s23  ;;  %p104_p5 = scmp.lt.s32.totalorder %s98_s23, %s98_s23 }
   0xd   :  { %p105_p6 = por %p104_p5, %p103_p4 }
   0xf   :  { %p106_p7 = pnand %p105_p6, %p99_p3 }
  0x11   :  { %109 = shalt.err (!%p106_p7)
}
  0x12   :  { %21 = dma.hbm_to_vmem [thread:$0]  %s223_s1, 256, %s19_s13, [#allocation5]  }
  0x13   :  { %s110_s28 = scalar_lea.hbm %s224_s2, 256 }
  0x14   :  { %p111_p8 = scmp.ne.s32.totalorder %s224_s2, %s110_s28  ;;  %p114_p9 = scmp.lt.u32.totalorder %s110_s28, %s224_s2 }
  0x16   :  { %p116_p10 = pnand %p114_p9, %p111_p8 }
  0x18   :  { %119 = shalt.err (!%p116_p10)
}
  0x19   :  { %s120_s6 = scalar_lea.vmem %s29_s15, 256  ;;  %p125_p12 = scmp.lt.s32.totalorder %s29_s15, %s29_s15 }
  0x1a   :  { %p121_p11 = scmp.ne.s32.totalorder %s29_s15, %s120_s6  ;;  %p126_p13 = scmp.lt.s32.totalorder %s120_s6, %s120_s6 }
  0x1c   :  { %p127_p0 = por %p126_p13, %p125_p12 }
  0x1e   :  { %p128_p1 = pnand %p127_p0, %p121_p11 }
  0x20   :  { %131 = shalt.err (!%p128_p1)
}
  0x21   :  { %31 = dma.hbm_to_vmem [thread:$0]  %s224_s2, 256, %s29_s15, [#allocation8]  }
  0x22   :  { %154 = dma.done.wait [#allocation5], 256  }
  0x23   :  { %155 = vsyncadd [#allocation5], 4294967040 }
  0x24   :  { %156 = dma.done.wait [#allocation8], 256  }
  0x25   :  { %157 = vsyncadd [#allocation8], 4294967040  ;;  %s40_s10 = smul.u32 2246822507, %s222_s0  ;;  %v42_v1 = vld [vmem:[#allocation4] sm:$0xff]  ;;  %v43_v2 = vld [vmem:[#allocation4 + $0x8] sm:$0xff] }
  0x26   :  { %v61_v12 = vld [vmem:[#allocation7] sm:$0xff]  ;;  %v62_v14 = vld [vmem:[#allocation7 + $0x8] sm:$0xff]  ;;  %s162_s0 = smov [#allocation9]  }
  0x27   :  { %v44_v0 = vstv %s40_s10  ;;  %v63_v17 = vmul.f32 1.1111112, %v61_v12  ;;  %v64_v18 = vmul.f32 1.1111112, %v62_v14  ;;  %s75_s2 = sshll.u32 %s162_s0, 4  ;;  %s76_s2 = int_to_ptr.vmem [resolvable:$true] %s75_s2 }
  0x28   :  { %v45_v3 = vadd.s32 %v44_v0, %v42_v1  ;;  %v46_v4 = vadd.s32 %v44_v0, %v43_v2  ;;  %s132_s11 = scalar_lea.vmem %s76_s2, 256  ;;  %p137_p3 = scmp.lt.s32.totalorder %s76_s2, %s76_s2 }
  0x29   :  { %p133_p2 = scmp.ne.s32.totalorder %s76_s2, %s132_s11  ;;  %p138_p4 = scmp.lt.s32.totalorder %s132_s11, %s132_s11 }
  0x2a   :  { %v47_v5 = vshrl.u32 %v45_v3, 16  ;;  %v48_v6 = vshrl.u32 %v46_v4, 16 }
  0x2b   :  { %p139_p5 = por %p138_p4, %p137_p3 }
  0x2c   :  { %v49_v7 = vxor.u32 %v47_v5, %v45_v3  ;;  %v50_v8 = vxor.u32 %v48_v6, %v46_v4 }
  0x2d   :  { %p140_p6 = pnand %p139_p5, %p133_p2 }
  0x2e   :  { %v51_v9 = vmul.u32 2146121005, %v49_v7  ;;  %v52_v10 = vmul.u32 2146121005, %v50_v8 }
  0x30   :  { %v53_v11 = vshrl.u32 %v51_v9, 15  ;;  %v54_v13 = vshrl.u32 %v52_v10, 15 }
  0x32   :  { %v55_v15 = vxor.u32 %v53_v11, %v51_v9  ;;  %v56_v16 = vxor.u32 %v54_v13, %v52_v10 }
  0x34   :  { %v57_v19 = vshrl.u32 %v55_v15, 1  ;;  %v58_v20 = vshrl.u32 %v56_v16, 1 }
  0x36   :  { %vm59_vm0 = vcmp.ge.s32.totalorder %v57_v19, 214748365  ;;  %vm60_vm1 = vcmp.ge.s32.totalorder %v58_v20, 214748365 }
  0x37   :  { %v65_v21 = vsel %vm59_vm0, %v63_v17, 0.0  ;;  %v66_v22 = vsel %vm60_vm1, %v64_v18, 0.0 }
  0x38   :  { %67 = vst [vmem:[#allocation9] sm:$0xff] %v65_v21  ;;  %68 = vst [vmem:[#allocation9 + $0x8] sm:$0xff] %v66_v22 }
  0x39   :  { %143 = shalt.err (!%p140_p6)
}
  0x3a   :  { %s144_s14 = scalar_lea.hbm %s225_s3, 256 }
  0x3b   :  { %p145_p7 = scmp.ne.s32.totalorder %s225_s3, %s144_s14  ;;  %p148_p8 = scmp.lt.u32.totalorder %s144_s14, %s225_s3 }
  0x3d   :  { %p150_p9 = pnand %p148_p8, %p145_p7 }
  0x3f   :  { %153 = shalt.err (!%p150_p9)
}
  0x40   :  { %78 = dma.vmem_to_hbm [thread:$0]  %s76_s2, 256, %s225_s3, [#allocation6]  }
  0x41   :  { %158 = dma.done.wait [#allocation6], 256  }
  0x42   :  { %159 = vsyncadd [#allocation6], 4294967040 }
  0x43   :  { %82 = vsyncpa [#allocation5], 1 }
  0x44   :  { %83 = vsyncpa [#allocation8], 1 }
  0x45   :  { %84 = vsyncpa [#allocation6], 1 }

</bundles_post_ra>
